<compile_context>
chip_gen: v7x
topology: tpu7x:2x2x1
jax: 0.10.0
libtpu: 0.0.40
codegen_flags: <defaults>
</compile_context>

<pallas_src>
import math

import jax
import jax.numpy as jnp
from jax.experimental import pallas as pl
from jax.experimental.pallas import tpu as pltpu


# ---------------------------------------------------------------------------
# Fused input projections: 8 projections, one pallas_call.
# ---------------------------------------------------------------------------
def _proj_kernel(src_ref, x_ref, w_ref, b_ref, o_ref):
    # src_ref: SMEM (8,) source-index table (used only by the index_map)
    # x_ref: (1, 1, tl, Din) bf16   w_ref: (1, Dout, Din) bf16
    # b_ref: (1, 1, Dout) f32       o_ref: (1, 1, tl, Dout) bf16
    del src_ref
    x = x_ref[0, 0]                      # (tl, Din) bf16
    w = w_ref[0]                         # (Dout, Din) bf16
    y = jax.lax.dot_general(             # x @ w.T without an in-kernel transpose
        x, w, (((1,), (1,)), ((), ())), preferred_element_type=jnp.float32)
    o_ref[0, 0] = (y + b_ref[0]).astype(o_ref.dtype)


def fused_projections(x_stack, w_stack, b_stack, src_idx, *, seq_tile=256):
    # x_stack: (S, B, L, Din) bf16; w_stack: (P, Dout, Din) bf16
    # b_stack: (P, 1, Dout) f32;    src_idx: (P,) int32
    S, B, L, Din = x_stack.shape
    P, Dout, _ = w_stack.shape
    tl = seq_tile if (L % seq_tile == 0) else L      # tile L for long sequences
    grid = (P, B, L // tl)
    return pl.pallas_call(
        _proj_kernel,
        out_shape=jax.ShapeDtypeStruct((P, B, L, Dout), jnp.bfloat16),
        grid_spec=pltpu.PrefetchScalarGridSpec(
            num_scalar_prefetch=1,
            grid=grid,
            in_specs=[
                pl.BlockSpec((1, 1, tl, Din),
                             lambda p, b, l, src: (src[p], b, l, 0)),
                pl.BlockSpec((1, Dout, Din),
                             lambda p, b, l, src: (p, 0, 0)),
                pl.BlockSpec((1, 1, Dout),
                             lambda p, b, l, src: (p, 0, 0)),
            ],
            out_specs=pl.BlockSpec((1, 1, tl, Dout),
                                   lambda p, b, l, src: (p, b, l, 0)),
        ),
        compiler_params=pltpu.CompilerParams(
            dimension_semantics=("arbitrary", "parallel", "parallel")),
    )(src_idx, x_stack, w_stack, b_stack)


# ---------------------------------------------------------------------------
# Fused attention core + output projections.
# ---------------------------------------------------------------------------
def _sdpa(q, k, v):
    # q: (M, dt) bf16, k/v: (L, dt) bf16 -> (M, dt) f32.  Scale already folded
    # into the q projections.
    # TODO(synk): mask path (masked_fill(mask == 0, -e)) not implemented; the
    # reference forward is exercised with mask=None.
    s = jax.lax.dot_general(q, k, (((1,), (1,)), ((), ())),
                            preferred_element_type=jnp.float32)      # (M, L)
    s = s - jnp.max(s, axis=-1, keepdims=True)
    p = jnp.exp(s)
    p = p * pl.reciprocal(jnp.sum(p, axis=-1, keepdims=True), approx=True)
    return jnp.dot(p.astype(v.dtype), v, preferred_element_type=jnp.float32)


def make_attn_kernel(n_head):
    def kernel(proj_ref, wx_ref, ws_ref, bx_ref, bs_ref, xo_ref, so_ref):
        # proj_ref: (8, 1, L, D) bf16 — [qx1, qx2, qs1, qs2, kx, vx, ks, vs]
        # wx_ref/ws_ref: (D, 2D) bf16; bx_ref/bs_ref: (1, D) f32
        # xo_ref/so_ref: (1, L, D) f32
        L = proj_ref.shape[2]
        D = proj_ref.shape[3]
        dt = D // n_head

        qx1 = proj_ref[0, 0]
        qx2 = proj_ref[1, 0]
        qs1 = proj_ref[2, 0]
        qs2 = proj_ref[3, 0]
        kx = proj_ref[4, 0]
        vx = proj_ref[5, 0]
        ks = proj_ref[6, 0]
        vs = proj_ref[7, 0]

        xcat_heads = []
        scat_heads = []
        for h in range(n_head):
            sl = slice(h * dt, (h + 1) * dt)
            # pair 1: queries (qx1, qs2) share (kx, vx) -> outputs (x, sx)
            qa = jnp.concatenate([qx1[:, sl], qs2[:, sl]], axis=0)   # (2L, dt)
            oa = _sdpa(qa, kx[:, sl], vx[:, sl])
            x_h, sx_h = oa[:L], oa[L:]
            # pair 2: queries (qs1, qx2) share (ks, vs) -> outputs (s, xs)
            qb = jnp.concatenate([qs1[:, sl], qx2[:, sl]], axis=0)
            ob = _sdpa(qb, ks[:, sl], vs[:, sl])
            s_h, xs_h = ob[:L], ob[L:]
            # torch: concat((xs, x), dim=-1) then head-concat -> [xs_h | x_h]
            xcat_heads.append(jnp.concatenate([xs_h, x_h], axis=-1))
            scat_heads.append(jnp.concatenate([sx_h, s_h], axis=-1))

        xcat = jnp.concatenate(xcat_heads, axis=-1)   # (L, 2D) f32
        scat = jnp.concatenate(scat_heads, axis=-1)

        # fused output projections (2D -> D), bf16 MXU inputs, f32 accumulate
        xo = jax.lax.dot_general(xcat.astype(jnp.bfloat16), wx_ref[...],
                                 (((1,), (1,)), ((), ())),
                                 preferred_element_type=jnp.float32) + bx_ref[...]
        so = jax.lax.dot_general(scat.astype(jnp.bfloat16), ws_ref[...],
                                 (((1,), (1,)), ((), ())),
                                 preferred_element_type=jnp.float32) + bs_ref[...]
        xo_ref[0] = xo
        so_ref[0] = so
    return kernel


def attention_core(proj, wx, ws, bx, bs, n_head):
    # proj: (8, B, L, D) bf16; wx/ws: (D, 2D) bf16; bx/bs: (1, D) f32
    P, B, L, D = proj.shape
    out_sh = jax.ShapeDtypeStruct((B, L, D), jnp.float32)
    return pl.pallas_call(
        make_attn_kernel(n_head),
        out_shape=(out_sh, out_sh),
        grid_spec=pltpu.PrefetchScalarGridSpec(
            num_scalar_prefetch=0,
            grid=(B,),
            in_specs=[
                pl.BlockSpec((P, 1, L, D), lambda b: (0, b, 0, 0)),
                pl.BlockSpec((D, 2 * D), lambda b: (0, 0)),
                pl.BlockSpec((D, 2 * D), lambda b: (0, 0)),
                pl.BlockSpec((1, D), lambda b: (0, 0)),
                pl.BlockSpec((1, D), lambda b: (0, 0)),
            ],
            out_specs=(pl.BlockSpec((1, L, D), lambda b: (b, 0, 0)),
                       pl.BlockSpec((1, L, D), lambda b: (b, 0, 0))),
        ),
        compiler_params=pltpu.CompilerParams(dimension_semantics=("parallel",)),
    )(proj, wx, ws, bx, bs)


# ---------------------------------------------------------------------------
# Module glue (parameter handling / stacking in plain JAX)
# ---------------------------------------------------------------------------
def init_linear(key, d_out, d_in):
    # torch nn.Linear default init: U(-1/sqrt(fan_in), 1/sqrt(fan_in))
    kw, kb = jax.random.split(key)
    bound = 1.0 / math.sqrt(d_in)
    w = jax.random.uniform(kw, (d_out, d_in), jnp.float32, -bound, bound)
    b = jax.random.uniform(kb, (d_out,), jnp.float32, -bound, bound)
    return w, b


def init_params(key, d_model):
    names = ["w_qx1", "w_qs1", "w_qx2", "w_qs2",
             "w_kx", "w_ks", "w_vx", "w_vs", "x_proj", "s_proj"]
    keys = jax.random.split(key, len(names))
    params = {}
    for name, k in zip(names, keys):
        d_in = 2 * d_model if name in ("x_proj", "s_proj") else d_model
        params[name] = init_linear(k, d_model, d_in)
    return params


def recurrent_attention(params, qx, kx, vx, qs, ks, vs, n_head):
    d_model = qx.shape[-1]
    dt = d_model // n_head
    scale = 1.0 / math.sqrt(dt)

    # stacked inputs / weights for the fused projection call
    x_stack = jnp.stack([qx, qs, kx, vx, ks, vs]).astype(jnp.bfloat16)
    proj_names = ["w_qx1", "w_qx2", "w_qs1", "w_qs2", "w_kx", "w_vx", "w_ks", "w_vs"]
    w_list, b_list = [], []
    for i, name in enumerate(proj_names):
        w, b = params[name]
        if i < 4:                       # fold attention scale into q projections
            w = w * scale
            b = b * scale
        w_list.append(w)
        b_list.append(b)
    w_stack = jnp.stack(w_list).astype(jnp.bfloat16)          # (8, D, D)
    b_stack = jnp.stack(b_list).reshape(8, 1, d_model)         # (8, 1, D) f32
    src_idx = jnp.array([0, 0, 1, 1, 2, 3, 4, 5], jnp.int32)

    proj = fused_projections(x_stack, w_stack, b_stack, src_idx)

    wx, bx = params["x_proj"]
    wsp, bsp = params["s_proj"]
    x_out, s_out = attention_core(
        proj,
        wx.astype(jnp.bfloat16), wsp.astype(jnp.bfloat16),
        bx.reshape(1, d_model), bsp.reshape(1, d_model),
        n_head)
    return x_out, s_out


# ---------------------------------------------------------------------------
# Pure-JAX f32 reference (mirrors the torch module exactly)
# ---------------------------------------------------------------------------
def _ref_linear(x, w, b):
    return x @ w.T + b


def _split_heads(t, n_head):
    B, L, D = t.shape
    return jnp.transpose(t.reshape(B, L, n_head, D // n_head), (0, 2, 1, 3))


def _concat_heads(t):
    B, H, L, Dt = t.shape
    return jnp.transpose(t, (0, 2, 1, 3)).reshape(B, L, H * Dt)


def _ref_sdpa(q, k, v):
    dt = q.shape[-1]
    score = jnp.einsum("bhld,bhmd->bhlm", q, k) / math.sqrt(dt)
    score = jax.nn.softmax(score, axis=-1)
    return jnp.einsum("bhlm,bhmd->bhld", score, v)


def recurrent_attention_ref(params, qx, kx, vx, qs, ks, vs, n_head):
    qx1 = _split_heads(_ref_linear(qx, *params["w_qx1"]), n_head)
    qs1 = _split_heads(_ref_linear(qs, *params["w_qs1"]), n_head)
    qx2 = _split_heads(_ref_linear(qx, *params["w_qx2"]), n_head)
    qs2 = _split_heads(_ref_linear(qs, *params["w_qs2"]), n_head)
    kxh = _split_heads(_ref_linear(kx, *params["w_kx"]), n_head)
    ksh = _split_heads(_ref_linear(ks, *params["w_ks"]), n_head)
    vxh = _split_heads(_ref_linear(vx, *params["w_vx"]), n_head)
    vsh = _split_heads(_ref_linear(vs, *params["w_vs"]), n_head)
    x = _ref_sdpa(qx1, kxh, vxh)
    s = _ref_sdpa(qs1, ksh, vsh)
    xs = _ref_sdpa(qx2, ksh, vsh)
    sx = _ref_sdpa(qs2, kxh, vxh)
    x_proj = _ref_linear(_concat_heads(jnp.concatenate((xs, x), axis=-1)),
                         *params["x_proj"])
    s_proj = _ref_linear(_concat_heads(jnp.concatenate((sx, s), axis=-1)),
                         *params["s_proj"])
    return x_proj, s_proj


if __name__ == "__main__":
    B, L, d_model, n_head = 2, 8, 32, 4

    key = jax.random.PRNGKey(0)
    kp, kqx, kkx, kvx, kqs, kks, kvs = jax.random.split(key, 7)
    params = init_params(kp, d_model)

    qx = jax.random.normal(kqx, (B, L, d_model), jnp.float32)
    kx = jax.random.normal(kkx, (B, L, d_model), jnp.float32)
    vx = jax.random.normal(kvx, (B, L, d_model), jnp.float32)
    qs = jax.random.normal(kqs, (B, L, d_model), jnp.float32)
    ks = jax.random.normal(kks, (B, L, d_model), jnp.float32)
    vs = jax.random.normal(kvs, (B, L, d_model), jnp.float32)

    x_out, s_out = recurrent_attention(params, qx, kx, vx, qs, ks, vs, n_head)
    jax.block_until_ready((x_out, s_out))

    # bf16 MXU inputs (f32 accumulation) + approx reciprocal loosen tolerance
    # vs. the pure-f32 reference.
    x_ref, s_ref = recurrent_attention_ref(params, qx, kx, vx, qs, ks, vs, n_head)
    assert jnp.allclose(x_out, x_ref, atol=5e-2, rtol=5e-2), "x_proj mismatch"
    assert jnp.allclose(s_out, s_ref, atol=5e-2, rtol=5e-2), "s_proj mismatch"

    print("KERNEL_OK")
</pallas_src>

<mosaic_0001>
module attributes {stable_mosaic.version = 11 : i64} {
  func.func @_proj_kernel(%arg0: i32, %arg1: i32, %arg2: i32, %arg3: memref<8xi32, #tpu.memory_space<smem>>, %arg4: memref<1x1x8x32xbf16, #tpu.memory_space<vmem>>, %arg5: memref<1x32x32xbf16, #tpu.memory_space<vmem>>, %arg6: memref<1x1x32xf32, #tpu.memory_space<vmem>>, %arg7: memref<1x1x8x32xbf16, #tpu.memory_space<vmem>>) attributes {dimension_semantics = [#tpu.dimension_semantics<arbitrary>, #tpu.dimension_semantics<parallel>, #tpu.dimension_semantics<parallel>], iteration_bounds = array<i64: 8, 2, 1>, scalar_prefetch = 1 : i64, scratch_operands = 0 : i64, tpu.core_type = #tpu.core_type<tc>, window_params = [{transform_indices = @transform_0, window_bounds = array<i64: 1, 1, 8, 32>}, {transform_indices = @transform_1, window_bounds = array<i64: 1, 32, 32>}, {transform_indices = @transform_2, window_bounds = array<i64: 1, 1, 32>}, {transform_indices = @transform_3, window_bounds = array<i64: 1, 1, 8, 32>}]} {
    %c0 = arith.constant 0 : index
    %c0_0 = arith.constant 0 : index
    %c0_1 = arith.constant 0 : index
    %c0_2 = arith.constant 0 : index
    %0 = vector.load %arg4[%c0, %c0_0, %c0_1, %c0_2] : memref<1x1x8x32xbf16, #tpu.memory_space<vmem>>, vector<1x1x8x32xbf16>
    %1 = vector.shape_cast %0 : vector<1x1x8x32xbf16> to vector<8x32xbf16>
    %c0_3 = arith.constant 0 : index
    %c0_4 = arith.constant 0 : index
    %c0_5 = arith.constant 0 : index
    %2 = vector.load %arg5[%c0_3, %c0_4, %c0_5] : memref<1x32x32xbf16, #tpu.memory_space<vmem>>, vector<1x32x32xbf16>
    %3 = vector.shape_cast %2 : vector<1x32x32xbf16> to vector<32x32xbf16>
    %cst = arith.constant dense<0.000000e+00> : vector<8x32xf32>
    %4 = tpu.matmul %1, %3, %cst {dimension_numbers = #tpu.dot_dimension_numbers<[1], [1], [0], [0], [0, 0, 1, 0], [], []>} : vector<8x32xbf16>, vector<32x32xbf16>, vector<8x32xf32> -> vector<8x32xf32>
    %c0_6 = arith.constant 0 : index
    %c0_7 = arith.constant 0 : index
    %c0_8 = arith.constant 0 : index
    %5 = vector.load %arg6[%c0_6, %c0_7, %c0_8] : memref<1x1x32xf32, #tpu.memory_space<vmem>>, vector<1x1x32xf32>
    %6 = vector.shape_cast %5 : vector<1x1x32xf32> to vector<1x32xf32>
    %7 = vector.broadcast %6 : vector<1x32xf32> to vector<8x32xf32>
    %8 = arith.addf %4, %7 : vector<8x32xf32>
    %9 = arith.truncf %8 : vector<8x32xf32> to vector<8x32xbf16>
    %c0_9 = arith.constant 0 : index
    %c0_10 = arith.constant 0 : index
    %c0_11 = arith.constant 0 : index
    %c0_12 = arith.constant 0 : index
    %10 = vector.load %arg7[%c0_9, %c0_10, %c0_11, %c0_12] : memref<1x1x8x32xbf16, #tpu.memory_space<vmem>>, vector<1x1x8x32xbf16>
    %11 = vector.shape_cast %10 : vector<1x1x8x32xbf16> to vector<8x32xbf16>
    %12 = vector.shape_cast %9 : vector<8x32xbf16> to vector<1x1x8x32xbf16>
    tpu.vector_store %arg7[%c0_9, %c0_10, %c0_11, %c0_12], %12 {strides = array<i32>} : memref<1x1x8x32xbf16, #tpu.memory_space<vmem>>, vector<1x1x8x32xbf16>,
    return
  }
  func.func @transform_0(%arg0: i32, %arg1: i32, %arg2: i32, %arg3: memref<8xi32, #tpu.memory_space<smem>>) -> (i32, i32, i32, i32) {
    %0 = arith.index_cast %arg0 : i32 to index
    %1 = memref.load %arg3[%0] : memref<8xi32, #tpu.memory_space<smem>>
    %c0_i32 = arith.constant 0 : i32
    %c0_i32_0 = arith.constant 0 : i32
    return %1, %arg1, %arg2, %c0_i32 : i32, i32, i32, i32
  }
  func.func @transform_1(%arg0: i32, %arg1: i32, %arg2: i32, %arg3: memref<8xi32, #tpu.memory_space<smem>>) -> (i32, i32, i32) {
    %c0_i32 = arith.constant 0 : i32
    %c0_i32_0 = arith.constant 0 : i32
    %c0_i32_1 = arith.constant 0 : i32
    return %arg0, %c0_i32, %c0_i32_0 : i32, i32, i32
  }
  func.func @transform_2(%arg0: i32, %arg1: i32, %arg2: i32, %arg3: memref<8xi32, #tpu.memory_space<smem>>) -> (i32, i32, i32) {
    %c0_i32 = arith.constant 0 : i32
    %c0_i32_0 = arith.constant 0 : i32
    %c0_i32_1 = arith.constant 0 : i32
    return %arg0, %c0_i32, %c0_i32_0 : i32, i32, i32
  }
  func.func @transform_3(%arg0: i32, %arg1: i32, %arg2: i32, %arg3: memref<8xi32, #tpu.memory_space<smem>>) -> (i32, i32, i32, i32) {
    %c0_i32 = arith.constant 0 : i32
    %c0_i32_0 = arith.constant 0 : i32
    return %arg0, %arg1, %arg2, %c0_i32 : i32, i32, i32, i32
  }
}

</mosaic_0001>

<bundles_post_ra>
// kernel: tpu_custom_call.1
= control target key start
LH: loop header
LB: loop body
LE: loop exit
PB: predicated region body
PF: predicated region fallthrough
CT: control target
= control target key end

     0   :  { %s1302_s0 = inlined_call_operand.hbm [shape: s32[8], index: 0, kind: input, shape index: {}]   ;;  %s1303_s1 = inlined_call_operand.hbm [shape: bf16[6,2,8,32], index: 1, kind: input, shape index: {}]   ;;  %s1304_s2 = inlined_call_operand.hbm [shape: bf16[8,32,32], index: 2, kind: input, shape index: {}]   ;;  %s1305_s3 = inlined_call_operand.vmem [shape: f32[8,1,32], index: 3, kind: input, shape index: {}]   ;;  %s1306_s4 = inlined_call_operand.hbm [shape: bf16[8,2,8,32], index: 4, kind: output, shape index: {}]  }
   0x1   :  { %1318 = sst [smem:[#allocation24_spill]] %s1306_s4  ;;  %s671_s17 = scalar_lea.hbm %s1302_s0, 16 }
   0x2   :  { %p672_p0 = scmp.ne.s32.totalorder %s1302_s0, %s671_s17  ;;  %p675_p1 = scmp.lt.u32.totalorder %s671_s17, %s1302_s0 }
   0x4   :  { %p677_p2 = pnand %p675_p1, %p672_p0 }
   0x6   :  { %680 = shalt.err (!%p677_p2)  }
   0x7   :  { %s895_s22 = smov [#allocation3]  }
   0x8   :  { %10 = dma.hbm_to_smem %s1302_s0, 16, %s895_s22, [#allocation2] }
   0x9   :  { %825 = dma.done.wait [#allocation2], 16 }
   0xa   :  { %826 = vsyncadd [#allocation2], 4294967280 }
   0xb   :  { %12 = sfence }
   0xc   :  { %13 = vsyncpa [#allocation5], 0 }
   0xd   :  { %15 = vsyncpa [#allocation5 + $0x1], 0 }
   0xe   :  { %16 = vsyncpa [#allocation8], 0 }
   0xf   :  { %18 = vsyncpa [#allocation8 + $0x1], 0 }
  0x10   :  { %19 = vsyncpa [#allocation6], 0 }
  0x11   :  { %21 = vsyncpa [#allocation6 + $0x1], 0  ;;  %s940_s25 = smov 0   ;;  %s942_s26 = smov 0  }
  0x12   :  { %s944_s27 = smov 0   ;;  %s946_s28 = smov 0  }
  0x13   :  { %s948_s29 = smov 0   ;;  %s950_s0 = smov 0  }
  0x14   :  { %s952_s30 = smov 0   ;;  %s954_s5 = smov 0  }
  0x15   :  { %s956_s6 = smov 0   ;;  %s958_s7 = smov 0  }
  0x16   :  { %s960_s8 = smov 0   ;;  %s962_s9 = smov 0  }
  0x17   :  { %s964_s10 = smov 0   ;;  %s966_s11 = smov 0  }
  0x18 LB: > { %1319 = sst [smem:[#allocation16_spill]] %s841_s25  ;;  %s494_s12 = sadd.s32 4294967295, %s893_s11   ;;  %s893_s11 = sphi %s966_s11, %s27_s11   ;;  %s889_s10 = sphi %s964_s10, %s1368_s10   ;;  %s885_s9 = sphi %s962_s9, %s1367_s9   ;;  %s881_s8 = sphi %s960_s8, %s1366_s8   ;;  %s877_s7 = sphi %s958_s7, %s1365_s7   ;;  %s873_s6 = sphi %s956_s6, %s1364_s6   ;;  %s869_s5 = sphi %s954_s5, %s1363_s5   ;;  %s865_s30 = sphi %s952_s30, %s1362_s30   ;;  %s861_s0 = sphi %s950_s0, %s1361_s0   ;;  %s857_s29 = sphi %s948_s29, %s1360_s29   ;;  %s853_s28 = sphi %s946_s28, %s1359_s28   ;;  %s849_s27 = sphi %s944_s27, %s1351_s27   ;;  %s845_s26 = sphi %s942_s26, %s1358_s26   ;;  %s841_s25 = sphi %s940_s25, %s1357_s25  }
  0x19   : > { %1320 = sst [smem:[#allocation17_spill]] %s849_s27  ;;  %s495_s13 = sadd.s32 4294967294, %s893_s11  }
  0x1a   : > { %1321 = sst [smem:[#allocation18_spill]] %s873_s6  ;;  %s42_s14 = sadd.s32 1, %s885_s9 }
  0x1b   : > { %s46_s15 = sadd.s32 1, %s889_s10  ;;  %p44_p3 = scmp.ge.s32.totalorder %s42_s14, 2 }
  0x1c   : > { %s50_s16 = sld [smem:[#allocation3 + %s889_s10]]  ;;  %p66_p4 = scmp.ne.s32.totalorder %s873_s6, %s869_s5 }
  0x1d   : > { %s1370_s14 = smov (%p44_p3, %s42_s14), 0  ;;  %s1372_s15 = smov (!%p44_p3, %s46_s15), %s889_s10 }
  0x1e   : > { %1322 = sst [smem:[#allocation19_spill]] %s1370_s14  ;;  %s53_s18 = ssub.s32 %s885_s9, %s1370_s14 }
  0x1f   : > { %p67_p5 = scmp.eq.s32.totalorder %s893_s11, 0  ;;  %p48_p6 = scmp.ge.s32.totalorder %s1372_s15, 8 }
  0x20   : > { %p72_p7 = scmp.ne.s32.totalorder %s869_s5, %s865_s30  ;;  %p1029_p9 = scmp.eq.s32.totalorder %s494_s12, 0 }
  0x21   : > { %p1025_p8 = por %p67_p5, %p66_p4  ;;  %s1374_s15 = smov (%p48_p6, %s1372_s15), 0 }
  0x22   : > { %1325 = sst [smem:[#allocation20_spill]] %s1374_s15  ;;  %p1037_p10 = por %p1029_p9, %p72_p7 }
  0x23   : > { %s141_s22 = sadd.s32 1, %s849_s27  ;;  %s51_s23 = sld [smem:[#allocation3 + %s1374_s15]] }
  0x24   : > { %s1326_s21 = scalar_select %p1037_p10, 1, 0 }
  0x25   : > { %s1045_s24 = ssub.s32 %s889_s10, %s1374_s15  ;;  %p151_p13 = scmp.ne.s32.totalorder %s849_s27, %s845_s26 }
  0x26   : > { %s136_s30 = sor.u32 %s1045_s24, %s53_s18  ;;  %p152_p0 = scmp.eq.s32.totalorder %s494_s12, 15 }
  0x27   : > { %p139_p12 = scmp.eq.s32.totalorder %s136_s30, 0  ;;  %p157_p1 = scmp.ne.s32.totalorder %s845_s26, %s841_s25 }
  0x28   : > { %p1056_p2 = por %p152_p0, %p151_p13  ;;  %p158_p3 = scmp.eq.s32.totalorder %s495_s13, 15 }
  0x29   : > { %s1054_s17 = scalar_select %p139_p12, %s849_s27, %s141_s22  }
  0x2a   : > { %s1328_s15 = scalar_select %p1056_p2, 1, 0 }
  0x2b   : > { %1327 = sst [smem:[#allocation21_spill]] %s1054_s17  ;;  %s52_s14 = ssub.s32 %s50_s16, %s51_s23 }
  0x2c   : > { %s54_s4 = sor.u32 %s53_s18, %s52_s14  ;;  %p1060_p4 = por %p158_p3, %p157_p1 }
  0x2d   : > { %p57_p6 = scmp.eq.s32.totalorder %s54_s4, 0  ;;  %p1312_p7 = scmp.lt.s32.totalorder %s893_s11, 16 }
  0x2e   : > { %s1329_s30 = scalar_select %p1060_p4, 1, 0 }
  0x2f   : > { %s178_s12 = sand.u32 1, %s873_s6   ;;  %p504_p12 = scmp.ge.s32.totalorder %s893_s11, 1 }
  0x30   : > { %1330 = sst [smem:[#allocation22_spill]] %s1329_s30  ;;  %s1331_s22 = sadd.s32 1, %s873_s6 }
  0x31   : > { %s1070_s17 = scalar_select %p57_p6, %s873_s6, %s1331_s22  }
  0x32   : > { %s498_s13 = sshll.u32 %s178_s12, 2  ;;  %p1076_p13 = pnand %p1312_p7, %p1025_p8 }
  0x33   : > { %1332 = sst [smem:[#allocation23_spill]] %s1070_s17  ;;  %s182_s18 = scalar_lea.vmem [#allocation4], %s498_s13 }
  0x34   : > { %s529_s4 = scalar_select %p1025_p8, [#allocation3], [#allocation10] }
  0x35   : > { %s530_s16 = scalar_select %p1025_p8, %s889_s10, 0 }
  0x36   : > { %s1376_s4 = smov (!%p1312_p7, %s529_s4), [#allocation11]  ;;  %s193_s23 = sshll.u32 %s182_s18, 4  ;;  %s1089_s23 = int_to_ptr.vmem [resolvable:$true] %s193_s23 }
  0x37   : > { %s1378_s16 = smov (!%p1312_p7, %s530_s16), 0  ;;  %p225_p0 = scmp.lt.s32.totalorder %s893_s11, 17 }
  0x38   : > { %s183_s22 = sld [smem:[%s1376_s4 + %s1378_s16]]  ;;  %s85_s19 = sadd.s32 1, %s861_s0 }
  0x39   : > { %p1094_p1 = pnand %p504_p12, %p225_p0  ;;  %p92_p8 = scmp.ne.s32.totalorder %s861_s0, %s857_s29 }
  0x3a   : > { %p98_p3 = scmp.ne.s32.totalorder %s857_s29, %s853_s28  ;;  %s200_s28 = sand.u32 1, %s861_s0  }
  0x3b   : > { %s1334_s17 = scalar_select %p1094_p1, 1, 0 }
  0x3c   : > { %p1106_p6 = por %p92_p8, %p67_p5  ;;  %p1112_p7 = por %p98_p3, %p1029_p9 }
  0x3d   : > { %p683_p12 = pneg %p1076_p13  ;;  %s686_s30 = scalar_lea.hbm %s1303_s1, 768 }
  0x3e   : > { %s499_s6 = sshll.u32 %s183_s22, 1 }
  0x3f   : > { %s189_s27 = sadd.s32 %s885_s9, %s499_s6  ;;  %s179_s6 = scalar_lea.sflag [#allocation5], %s178_s12 }
  0x40   : > { %s500_s4 = sshll.u32 %s189_s27, 6 }
  0x41   : > { %s1336_s16 = scalar_select %p1112_p7, 1, 0 }
  0x42   : > { %s1119_s25 = scalar_lea.hbm %s1303_s1, %s500_s4 }
  0x43   : > { %s681_s22 = scalar_lea.hbm %s1119_s25, 64  ;;  %p687_p8 = scmp.lt.u32.totalorder %s1119_s25, %s1303_s1 }
  0x44   : > { %p682_p5 = scmp.ne.s32.totalorder %s1119_s25, %s681_s22  ;;  %p688_p3 = scmp.lt.u32.totalorder %s686_s30, %s681_s22 }
  0x45   : > { %p690_p4 = scmp.lt.u32.totalorder %s681_s22, %s1119_s25 }
  0x46   : > { %p684_p9 = pnand %p683_p12, %p682_p5  ;;  %p689_p11 = por %p688_p3, %p687_p8 }
  0x48   : > { %p685_p0 = pneg %p684_p9  ;;  %p691_p2 = por %p690_p4, %p689_p11 }
  0x4a   : > { %p692_p7 = pnand %p691_p2, %p685_p0 }
  0x4c   : > { %695 = shalt.err (!%p692_p7)
}
  0x4d   : > { %s696_s12 = scalar_lea.vmem %s1089_s23, 64  ;;  %s896_s27 = smov [#allocation4]  }
  0x4e   : > { %p697_p5 = scmp.ne.s32.totalorder %s1089_s23, %s696_s12  ;;  %s701_s20 = sshll.u32 %s896_s27, 4  ;;  %s702_s20 = int_to_ptr.vmem [resolvable:$false] %s701_s20 }
  0x4f   : > { %s703_s4 = scalar_lea.vmem %s702_s20, 128  ;;  %p704_p1 = scmp.lt.s32.totalorder %s1089_s23, %s702_s20 }
  0x50   : > { %p699_p9 = pnand %p697_p5, %p683_p12  ;;  %p705_p8 = scmp.lt.s32.totalorder %s703_s4, %s696_s12 }
  0x52   : > { %p700_p10 = pneg %p699_p9  ;;  %p706_p3 = por %p705_p8, %p704_p1 }
  0x54   : > { %p707_p11 = pnand %p706_p3, %p700_p10 }
  0x56   : > { %710 = shalt.err (!%p707_p11)
}
  0x57   : > { %542 = dma.hbm_to_vmem [thread:$0]  (!%p1076_p13), %s1119_s25, 64, %s1089_s23, %s179_s6  }
  0x58   : > { %p1337_p2 = scmp.eq.s32.totalorder %s1045_s24, 0  ;;  %s501_s30 = sshll.u32 %s200_s28, 4 }
  0x59   : > { %s517_s18 = sshll.u32 %s889_s10, 8  ;;  %s204_s20 = scalar_lea.vmem [#allocation7], %s501_s30 }
  0x5a   : > { %s1152_s22 = scalar_select %p1337_p2, %s861_s0, %s85_s19  }
  0x5b   : > { %s1160_s27 = scalar_lea.hbm %s1304_s2, %s517_s18  ;;  %s211_s4 = sshll.u32 %s204_s20, 4  ;;  %s1162_s4 = int_to_ptr.vmem [resolvable:$true] %s211_s4 }
  0x5c   : > { %p1338_p10 = scmp.lt.s32.totalorder %s893_s11, 16  ;;  %s1174_s24 = scalar_lea.sflag [#allocation8], %s200_s28 }
  0x5d   : > { %s711_s23 = scalar_lea.hbm %s1160_s27, 256  ;;  %s716_s6 = scalar_lea.hbm %s1304_s2, 2048 }
  0x5e   : > { %p1168_p4 = pnand %p1338_p10, %p1106_p6  ;;  %p712_p7 = scmp.ne.s32.totalorder %s1160_s27, %s711_s23 }
  0x5f   : > { %p717_p6 = scmp.lt.u32.totalorder %s1160_s27, %s1304_s2  ;;  %p718_p0 = scmp.lt.u32.totalorder %s716_s6, %s711_s23 }
  0x60   : > { %p713_p13 = pneg %p1168_p4  ;;  %p720_p9 = scmp.lt.u32.totalorder %s711_s23, %s1160_s27 }
  0x61   : > { %p719_p5 = por %p718_p0, %p717_p6 }
  0x62   : > { %p714_p1 = pnand %p713_p13, %p712_p7 }
  0x63   : > { %p721_p8 = por %p720_p9, %p719_p5 }
  0x64   : > { %p715_p12 = pneg %p714_p1 }
  0x66   : > { %p722_p3 = pnand %p721_p8, %p715_p12 }
  0x68   : > { %725 = shalt.err (!%p722_p3)
}
  0x69   : > { %s726_s28 = scalar_lea.vmem %s1162_s4, 256  ;;  %s897_s12 = smov [#allocation7]  }
  0x6a   : > { %p727_p11 = scmp.ne.s32.totalorder %s1162_s4, %s726_s28  ;;  %s731_s14 = sshll.u32 %s897_s12, 4  ;;  %s732_s14 = int_to_ptr.vmem [resolvable:$false] %s731_s14 }
  0x6b   : > { %s733_s20 = scalar_lea.vmem %s732_s14, 512  ;;  %p734_p7 = scmp.lt.s32.totalorder %s1162_s4, %s732_s14 }
  0x6c   : > { %p729_p2 = pnand %p727_p11, %p713_p13  ;;  %p735_p1 = scmp.lt.s32.totalorder %s733_s20, %s726_s28 }
  0x6e   : > { %p730_p10 = pneg %p729_p2  ;;  %p736_p6 = por %p735_p1, %p734_p7 }
  0x70   : > { %p737_p0 = pnand %p736_p6, %p730_p10 }
  0x72   : > { %740 = shalt.err (!%p737_p0)
}
  0x73   : > { %s898_s23 = smov 64   ;;  %s899_s19 = smov 4  }
  0x74   : > { %545 = dma.hbm_to_vmem [thread:$0]  (!%p1168_p4), %s1160_s27, 256, %s1162_s4, %s1174_s24, %s898_s23, %s898_s23, %s899_s19  }
  0x75   : > { %p1340_p13 = scmp.ne.s32.totalorder %s1334_s17, 0 }
  0x76   : > { %s231_s13 = sand.u32 (!%p1340_p13), 1, %s869_s5   ;;  %p1341_p12 = scmp.ne.s32.totalorder (!%p1340_p13), %s1326_s21, 0 }
  0x77   : > { %229 = sbr.rel (%p1340_p13) target bundleno = 378 (0x17a), region = 32  ;;  %s505_s6 = sshll.u32 (!%p1340_p13), %s231_s13, 2 }
  0x78   : > { %s232_s30 = scalar_lea.sflag (!%p1340_p13), [#allocation5], %s231_s13  ;;  %s235_s18 = scalar_lea.vmem (!%p1340_p13), [#allocation4], %s505_s6 }
  0x7e   : > { %828 = dma.done.wait (%p1341_p12), %s232_s30, 64  }
  0x7f   : > { %830 = vsyncadd (%p1341_p12), %s232_s30, 4294967232  ;;  %s240_s28 = sand.u32 1, %s857_s29   ;;  %p1342_p4 = scmp.ne.s32.totalorder %s1336_s16, 0 }
  0x80   : > { %s506_s12 = sshll.u32 %s240_s28, 4  ;;  %s241_s25 = scalar_lea.sflag [#allocation8], %s240_s28 }
  0x81   : > { %s244_s27 = scalar_lea.vmem [#allocation7], %s506_s12 }
  0x82   : > { %832 = dma.done.wait (%p1342_p4), %s241_s25, 256  }
  0x83   : > { %834 = vsyncadd (%p1342_p4), %s241_s25, 4294967040  ;;  %v900_v0 = vmov 0.0   ;;  %vm901_vm0 = vmmov 0   ;;  %vm302_vm1 = vcmask 261120   ;;  %v669_v1 = vld [vmem:[%s244_s27] sm:$0xff]   ;;  %v670_v3 = vld [vmem:[%s244_s27 + $0x8] sm:$0xff]  }
  0x84   : > { %521 = vmatprep.subr.bf16.mxu0 %v900_v0  ;;  %525 = vmatprep.mubr.msk.bf16.mxu0 %vm901_vm0, %v900_v0  ;;  %v307_v2 = vsel %vm302_vm1, %v669_v1, 0  ;;  %v310_v4 = vsel %vm302_vm1, %v670_v3, 0  ;;  %v280_v5 = vld [vmem:[%s235_s18] sm:$0xf]  ;;  %p276_p5 = scmp.lt.s32.totalorder %s881_s8, 7  ;;  %s272_s21 = sand.u32 1, %s845_s26  }
  0x85   : > { %522 = vmatpush3.bf16.xpose.msra.mxu0 %v307_v2  ;;  %s507_s16 = sshll.u32 %s272_s21, 2  ;;  %s513_s4 = sshll.u32 %s881_s8, 1  ;;  %vm353_vm2 = vcmask 257024  }
  0x86   : > { %523 = vmatprep.subr.bf16.mxu0 %v900_v0  ;;  %s277_s17 = scalar_select %p276_p5, %s881_s8, 7 }
  0x87   : > { %s368_s23 = sadd.s32 %s877_s7, %s513_s4  ;;  %s274_s13 = scalar_lea.vmem [#allocation9], %s507_s16 }
  0x88   : > { %s278_s20 = scalar_lea.vmem %s1305_s3, %s277_s17  ;;  %s514_s19 = sshll.u32 %s368_s23, 6 }
  0x89   : > { %v508_v6 = vld [vmem:[%s278_s20] ss:$0 sm:$0xff]  ;;  %s372_s6 = sshll.u32 %s274_s13, 4  ;;  %s1343_s8 = sld [smem:[#allocation24_spill]]  ;;  %s1227_s6 = int_to_ptr.vmem [resolvable:$true] %s372_s6 }
  0x8a   : > { %s356_s7 = scalar_lea.sflag [#allocation6], %s272_s21  ;;  %s741_s25 = scalar_lea.vmem %s1227_s6, 64 }
  0x8b   : > { %p742_p9 = scmp.ne.s32.totalorder %s1227_s6, %s741_s25  ;;  %p1345_p8 = scmp.ne.s32.totalorder %s1328_s15, 0 }
  0x8c   : > { %s902_s27 = smov [#allocation9]  }
  0x8d   : > { %524 = vmatpush3.bf16.xpose.msra.mxu0 %v310_v4  ;;  %p743_p3 = pnand %p742_p9, %p1345_p8  ;;  %s745_s17 = sshll.u32 %s902_s27, 4  ;;  %s746_s17 = int_to_ptr.vmem [resolvable:$false] %s745_s17 }
  0x8e   : > { %s747_s16 = scalar_lea.vmem %s746_s17, 128  ;;  %p748_p2 = scmp.lt.s32.totalorder %s1227_s6, %s746_s17 }
  0x8f   : > { %s1344_s12 = smov %s1343_s8  ;;  %s1225_s28 = scalar_lea.hbm %s1343_s8, %s514_s19 }
  0x90   : > { %p744_p11 = pneg %p743_p3  ;;  %p749_p10 = scmp.lt.s32.totalorder %s747_s16, %s741_s25 }
  0x92   : > { %p750_p7 = por %p749_p10, %p748_p2 }
  0x94   : > { %526 = vmatmul.mubr.msk.bf16.vlgmr.msra.gmra.mrb[0].mxu0 %vm302_vm1, %v280_v5  ;;  %p751_p1 = pnand %p750_p7, %p744_p11 }
 0x167   : > { %v346_v7 = vpop.f32.mrb[0].mxu0 }
 0x168   : > { %v347_v8 = vadd.f32 %v508_v6, %v346_v7  ;;  %v527_v9 = vpop.f32.mrb[1].mxu0 }
 0x169   : > { %v349_v10 = vpop.f32.mrb[2].mxu0 }
 0x16a   : > { %v352_v11 = vpack.c.bf16 %v347_v8, %v347_v8  ;;  %v528_v12 = vpop.f32.mrb[3].mxu0 }
 0x16c   : > { %354 = vst.msk [vmem:[%s274_s13] sm:$0xf] %vm353_vm2, %v352_v11 }
 0x16d   : > { %754 = shalt.err (!%p751_p1)
}
 0x16e   : > { %s755_s21 = scalar_lea.hbm %s1225_s28, 64  ;;  %s759_s14 = scalar_lea.hbm %s1344_s12, 1024 }
 0x16f   : > { %p756_p6 = scmp.ne.s32.totalorder %s1225_s28, %s755_s21  ;;  %p760_p12 = scmp.lt.u32.totalorder %s1225_s28, %s1344_s12 }
 0x170   : > { %p761_p4 = scmp.lt.u32.totalorder %s759_s14, %s755_s21  ;;  %p763_p9 = scmp.lt.u32.totalorder %s755_s21, %s1225_s28 }
 0x171   : > { %p757_p0 = pnand %p756_p6, %p1345_p8 }
 0x172   : > { %p762_p5 = por %p761_p4, %p760_p12 }
 0x173   : > { %p758_p13 = pneg %p757_p0 }
 0x174   : > { %p764_p3 = por %p763_p9, %p762_p5 }
 0x176   : > { %p765_p11 = pnand %p764_p3, %p758_p13 }
 0x178   : > { %768 = shalt.err (!%p765_p11)
}
 0x179   : > { %535 = dma.vmem_to_hbm [thread:$0]  (%p1345_p8), %s1227_s6, 64, %s1225_s28, %s356_s7  }
 0x17a PF: > { %s1346_s19 = sld [smem:[#allocation16_spill]]  ;;  %s1347_s13 = sld [smem:[#allocation22_spill]] }
 0x17b   : > { %p551_p2 = scmp.ge.s32.totalorder %s893_s11, 2 }
 0x180   : > { %s384_s30 = sand.u32 1, %s1346_s19   ;;  %p1348_p10 = scmp.ne.s32.totalorder %s1347_s13, 0 }
 0x181   : > { %s385_s18 = scalar_lea.sflag [#allocation6], %s384_s30 }
 0x182   : > { %p547_p7 = pnand %p551_p2, %p1348_p10 }
 0x184   : > { %836 = dma.done.wait (!%p547_p7), %s385_s18, 64  }
 0x185   : > { %838 = vsyncadd (!%p547_p7), %s385_s18, 4294967232  ;;  %s27_s11 = sadd.s32 1, %s893_s11   ;;  %s1350_s15 = sld [smem:[#allocation17_spill]] }
 0x186   : > { %p1255_p1 = scmp.ge.s32.totalorder %s27_s11, 18   ;;  %s1351_s27 = sld [smem:[#allocation21_spill]] }
 0x187   : > { %s1352_s6 = sld [smem:[#allocation18_spill]]  ;;  %s1353_s7 = sld [smem:[#allocation23_spill]] }
 0x188   : > { %s1354_s17 = sld [smem:[#allocation19_spill]]  ;;  %s1355_s16 = sld [smem:[#allocation20_spill]] }
 0x189   : > { %s1357_s25 = smov %s845_s26  ;;  %s1359_s28 = smov %s857_s29 }
 0x18a   : > { %s1360_s29 = smov %s861_s0  ;;  %s1361_s0 = smov %s1152_s22 }
 0x18b   : > { %s1358_s26 = smov %s1350_s15  ;;  %s1362_s30 = smov %s869_s5 }
 0x18c   : > { %s1366_s8 = smov %s889_s10  ;;  %26 = sbr.rel (!%p1255_p1) target bundleno = 24 (0x18), region = 93 }
 0x18d   : > { %s1363_s5 = smov %s1352_s6  ;;  %s1364_s6 = smov %s1353_s7 }
 0x18e   : > { %s1365_s7 = smov %s885_s9  ;;  %s1367_s9 = smov %s1354_s17 }
 0x18f   : > { %s1368_s10 = smov %s1355_s16 }
 0x193   :  { %390 = vsyncpa [#allocation5], 1 }
 0x194   :  { %392 = vsyncpa [#allocation5 + $0x1], 1 }
 0x195   :  { %393 = vsyncpa [#allocation8], 1 }
 0x196   :  { %395 = vsyncpa [#allocation8 + $0x1], 1 }
 0x197   :  { %396 = vsyncpa [#allocation6], 1 }
 0x198   :  { %398 = vsyncpa [#allocation6 + $0x1], 1 }

</bundles_post_ra>
